<compile_context>
chip_gen: v5e
topology: v5e:2x2
jax: 0.10.0
libtpu: 0.0.40
codegen_flags: <defaults>
</compile_context>

<pallas_src>
import jax
import jax.numpy as jnp
from jax import lax
from jax.experimental import pallas as pl
from jax.experimental.pallas import tpu as pltpu


def _tconv_bn_relu_kernel(x_ref, w_ref, b_ref, o_ref):
    # x_ref: (C, TS)   input tile, batch+spatial flattened in the lane dim
    # w_ref: (KO, C)   BN-folded weights, KO = 8*O rows (tap-major: row = t*O + o)
    # b_ref: (KO, 1)   BN-folded bias (replicated per tap)
    # o_ref: (KO, TS)  fused ConvTranspose+BN+ReLU output tile (lane-dense)
    x = x_ref[...].astype(jnp.float32)          # (C, TS)
    w = w_ref[...].astype(jnp.float32)          # (KO, C)
    C = x.shape[0]
    KO, TS = o_ref.shape

    if C >= 32:
        # Large channel count: use the MXU.
        acc = jnp.dot(w, x, preferred_element_type=jnp.float32)      # (KO, TS)
    else:
        # Tiny K: a handful of VPU broadcast-FMAs beats a <1%-utilized matmul.
        acc = jnp.zeros((KO, TS), jnp.float32)
        for c in range(C):                                           # static unroll
            acc = acc + w[:, c:c + 1] * x[c:c + 1, :]                # (KO,1)*(1,TS)

    acc = acc + b_ref[...]                                           # (KO,1) bcast
    o_ref[...] = jnp.maximum(acc, 0.0).astype(o_ref.dtype)


def _pick_tile(ns):
    # Lanes a multiple of 128, tiles reasonably wide for DMA efficiency, but at
    # least ~4 grid steps so the pipeline (and both v7x TensorCores) stay busy.
    tile = (ns // 4 // 128) * 128
    return max(128, min(2048, tile))


def transpose_conv_forward(x, w, b, bn_gamma, bn_beta, bn_mean, bn_var, eps=1e-5):
    """Eval-mode forward of `transpose_conv`.

    x: (N, C, D, H, W); w: (C, O, 2, 2, 2) (PyTorch ConvTranspose3d layout);
    b, bn_*: (O,). Returns (N, O, 2D, 2H, 2W).
    """
    N, C, D, H, W = x.shape
    Cw, O, kD, kH, kW = w.shape
    assert Cw == C and (kD, kH, kW) == (2, 2, 2)
    S = D * H * W
    NS = N * S
    KO = kD * kH * kW * O  # 8 * O

    # ---- glue: fold BatchNorm (eval, running stats) into conv weight / bias ----
    scale = bn_gamma / jnp.sqrt(bn_var + eps)                          # (O,)
    w_fold = jnp.transpose(w, (2, 3, 4, 1, 0))                         # (2,2,2,O,C)
    w_fold = w_fold * scale[None, None, None, :, None]
    w_fold = w_fold.reshape(KO, C).astype(jnp.float32)                 # (KO, C)
    b_fold = (b - bn_mean) * scale + bn_beta                           # (O,)
    b_fold = jnp.tile(b_fold, kD * kH * kW).reshape(KO, 1).astype(jnp.float32)

    # ---- glue: lane-dense input (C, N*D*H*W), padded to a tile multiple ----
    x_flat = jnp.transpose(x, (1, 0, 2, 3, 4)).reshape(C, NS)
    TS = _pick_tile(NS)
    NS_pad = pl.cdiv(NS, TS) * TS
    if NS_pad != NS:
        x_flat = jnp.pad(x_flat, ((0, 0), (0, NS_pad - NS)))

    out_flat = pl.pallas_call(
        _tconv_bn_relu_kernel,
        out_shape=jax.ShapeDtypeStruct((KO, NS_pad), x.dtype),
        grid_spec=pltpu.PrefetchScalarGridSpec(
            num_scalar_prefetch=0,
            grid=(NS_pad // TS,),
            in_specs=[
                pl.BlockSpec((C, TS), lambda i: (0, i)),     # input tile
                pl.BlockSpec((KO, C), lambda i: (0, 0)),     # weights (resident)
                pl.BlockSpec((KO, 1), lambda i: (0, 0)),     # bias (resident)
            ],
            out_specs=pl.BlockSpec((KO, TS), lambda i: (0, i)),
        ),
        compiler_params=pltpu.CompilerParams(
            dimension_semantics=("parallel",)),
    )(x_flat, w_fold, b_fold)

    # ---- glue: interleave the 8 tap planes into the 2x-upsampled output ----
    out_flat = out_flat[:, :NS]
    out = out_flat.reshape(kD, kH, kW, O, N, D, H, W)
    out = jnp.transpose(out, (4, 3, 5, 0, 6, 1, 7, 2))       # (N,O,D,kd,H,kh,W,kw)
    return out.reshape(N, O, D * kD, H * kH, W * kW)


def _reference(x, w, b, bn_gamma, bn_beta, bn_mean, bn_var, eps=1e-5):
    """Pure-JAX reference: ConvTranspose3d(k=s=2) + BatchNorm3d(eval) + ReLU."""
    C, O = w.shape[0], w.shape[1]
    # Transposed conv == conv with lhs_dilation=stride, flipped & transposed kernel.
    w_f = jnp.flip(w, axis=(2, 3, 4))
    w_f = jnp.transpose(w_f, (1, 0, 2, 3, 4))                          # (O,C,2,2,2)
    y = lax.conv_general_dilated(
        x, w_f, window_strides=(1, 1, 1),
        padding=((1, 1), (1, 1), (1, 1)),
        lhs_dilation=(2, 2, 2),
        dimension_numbers=('NCDHW', 'OIDHW', 'NCDHW'))
    y = y + b.reshape(1, O, 1, 1, 1)
    y = (y - bn_mean.reshape(1, O, 1, 1, 1)) / jnp.sqrt(
        bn_var.reshape(1, O, 1, 1, 1) + eps)
    y = y * bn_gamma.reshape(1, O, 1, 1, 1) + bn_beta.reshape(1, O, 1, 1, 1)
    return jnp.maximum(y, 0.0)                                         # Dropout3d: eval = identity


if __name__ == "__main__":
    key = jax.random.PRNGKey(0)
    k1, k2, k3, k4, k5, k6, k7 = jax.random.split(key, 7)

    N, Cin, Cout = 2, 4, 8
    D = H = W = 8

    x = jax.random.normal(k1, (N, Cin, D, H, W), jnp.float32)

    # Synthetic, deterministic parameters (PyTorch-like uniform bounds).
    bound = 1.0 / jnp.sqrt(Cin * 8.0)
    w = jax.random.uniform(k2, (Cin, Cout, 2, 2, 2), jnp.float32, -bound, bound)
    b = jax.random.uniform(k3, (Cout,), jnp.float32, -bound, bound)
    bn_gamma = jax.random.uniform(k4, (Cout,), jnp.float32, 0.5, 1.5)
    bn_beta = jax.random.uniform(k5, (Cout,), jnp.float32, -0.5, 0.5)
    bn_mean = jax.random.uniform(k6, (Cout,), jnp.float32, -0.5, 0.5)
    bn_var = jax.random.uniform(k7, (Cout,), jnp.float32, 0.5, 1.5)

    out = jax.jit(transpose_conv_forward)(x, w, b, bn_gamma, bn_beta, bn_mean, bn_var)
    out = jax.block_until_ready(out)

    ref = _reference(x, w, b, bn_gamma, bn_beta, bn_mean, bn_var)
    assert out.shape == (N, Cout, 2 * D, 2 * H, 2 * W), out.shape
    assert jnp.allclose(out, ref, atol=1e-4, rtol=1e-4), \
        float(jnp.max(jnp.abs(out - ref)))

    print("KERNEL_OK")
</pallas_src>

<mosaic_0001>
module attributes {stable_mosaic.version = 11 : i64} {
  func.func @_tconv_bn_relu_kernel(%arg0: i32, %arg1: memref<4x256xf32, #tpu.memory_space<vmem>>, %arg2: memref<64x4xf32, #tpu.memory_space<vmem>>, %arg3: memref<64x1xf32, #tpu.memory_space<vmem>>, %arg4: memref<64x256xf32, #tpu.memory_space<vmem>>) attributes {dimension_semantics = [#tpu.dimension_semantics<parallel>], iteration_bounds = array<i64: 4>, scalar_prefetch = 0 : i64, scratch_operands = 0 : i64, tpu.core_type = #tpu.core_type<tc>, window_params = [{transform_indices = @transform_0, window_bounds = array<i64: 4, 256>}, {pipeline_mode = #tpu.pipeline_mode<synchronous>, transform_indices = @transform_1, window_bounds = array<i64: 64, 4>}, {pipeline_mode = #tpu.pipeline_mode<synchronous>, transform_indices = @transform_2, window_bounds = array<i64: 64, 1>}, {transform_indices = @transform_3, window_bounds = array<i64: 64, 256>}]} {
    %c0 = arith.constant 0 : index
    %c0_0 = arith.constant 0 : index
    %0 = vector.load %arg1[%c0, %c0_0] : memref<4x256xf32, #tpu.memory_space<vmem>>, vector<4x256xf32>
    %c0_1 = arith.constant 0 : index
    %c0_2 = arith.constant 0 : index
    %1 = vector.load %arg2[%c0_1, %c0_2] : memref<64x4xf32, #tpu.memory_space<vmem>>, vector<64x4xf32>
    %cst = arith.constant 0.000000e+00 : f32
    %2 = vector.broadcast %cst : f32 to vector<64x256xf32>
    %3 = vector.extract_strided_slice %1 {offsets = [0, 0], sizes = [64, 1], strides = [1, 1]} : vector<64x4xf32> to vector<64x1xf32>
    %4 = vector.extract_strided_slice %0 {offsets = [0, 0], sizes = [1, 256], strides = [1, 1]} : vector<4x256xf32> to vector<1x256xf32>
    %5 = vector.broadcast %3 : vector<64x1xf32> to vector<64x256xf32>
    %6 = vector.broadcast %4 : vector<1x256xf32> to vector<64x256xf32>
    %7 = arith.mulf %5, %6 : vector<64x256xf32>
    %8 = arith.addf %2, %7 : vector<64x256xf32>
    %9 = vector.extract_strided_slice %1 {offsets = [0, 1], sizes = [64, 1], strides = [1, 1]} : vector<64x4xf32> to vector<64x1xf32>
    %10 = vector.extract_strided_slice %0 {offsets = [1, 0], sizes = [1, 256], strides = [1, 1]} : vector<4x256xf32> to vector<1x256xf32>
    %11 = vector.broadcast %9 : vector<64x1xf32> to vector<64x256xf32>
    %12 = vector.broadcast %10 : vector<1x256xf32> to vector<64x256xf32>
    %13 = arith.mulf %11, %12 : vector<64x256xf32>
    %14 = arith.addf %8, %13 : vector<64x256xf32>
    %15 = vector.extract_strided_slice %1 {offsets = [0, 2], sizes = [64, 1], strides = [1, 1]} : vector<64x4xf32> to vector<64x1xf32>
    %16 = vector.extract_strided_slice %0 {offsets = [2, 0], sizes = [1, 256], strides = [1, 1]} : vector<4x256xf32> to vector<1x256xf32>
    %17 = vector.broadcast %15 : vector<64x1xf32> to vector<64x256xf32>
    %18 = vector.broadcast %16 : vector<1x256xf32> to vector<64x256xf32>
    %19 = arith.mulf %17, %18 : vector<64x256xf32>
    %20 = arith.addf %14, %19 : vector<64x256xf32>
    %21 = vector.extract_strided_slice %1 {offsets = [0, 3], sizes = [64, 1], strides = [1, 1]} : vector<64x4xf32> to vector<64x1xf32>
    %22 = vector.extract_strided_slice %0 {offsets = [3, 0], sizes = [1, 256], strides = [1, 1]} : vector<4x256xf32> to vector<1x256xf32>
    %23 = vector.broadcast %21 : vector<64x1xf32> to vector<64x256xf32>
    %24 = vector.broadcast %22 : vector<1x256xf32> to vector<64x256xf32>
    %25 = arith.mulf %23, %24 : vector<64x256xf32>
    %26 = arith.addf %20, %25 : vector<64x256xf32>
    %c0_3 = arith.constant 0 : index
    %c0_4 = arith.constant 0 : index
    %27 = vector.load %arg3[%c0_3, %c0_4] : memref<64x1xf32, #tpu.memory_space<vmem>>, vector<64x1xf32>
    %28 = vector.broadcast %27 : vector<64x1xf32> to vector<64x256xf32>
    %29 = arith.addf %26, %28 : vector<64x256xf32>
    %cst_5 = arith.constant 0.000000e+00 : f32
    %30 = vector.broadcast %cst_5 : f32 to vector<64x256xf32>
    %31 = arith.maximumf %29, %30 : vector<64x256xf32>
    %c0_6 = arith.constant 0 : index
    %c0_7 = arith.constant 0 : index
    %32 = vector.load %arg4[%c0_6, %c0_7] : memref<64x256xf32, #tpu.memory_space<vmem>>, vector<64x256xf32>
    tpu.vector_store %arg4[%c0_6, %c0_7], %31 {strides = array<i32>} : memref<64x256xf32, #tpu.memory_space<vmem>>, vector<64x256xf32>,
    return
  }
  func.func @transform_0(%arg0: i32) -> (i32, i32) {
    %c0_i32 = arith.constant 0 : i32
    %c0_i32_0 = arith.constant 0 : i32
    return %c0_i32, %arg0 : i32, i32
  }
  func.func @transform_1(%arg0: i32) -> (i32, i32) {
    %c0_i32 = arith.constant 0 : i32
    %c0_i32_0 = arith.constant 0 : i32
    %c0_i32_1 = arith.constant 0 : i32
    return %c0_i32, %c0_i32_0 : i32, i32
  }
  func.func @transform_2(%arg0: i32) -> (i32, i32) {
    %c0_i32 = arith.constant 0 : i32
    %c0_i32_0 = arith.constant 0 : i32
    %c0_i32_1 = arith.constant 0 : i32
    return %c0_i32, %c0_i32_0 : i32, i32
  }
  func.func @transform_3(%arg0: i32) -> (i32, i32) {
    %c0_i32 = arith.constant 0 : i32
    %c0_i32_0 = arith.constant 0 : i32
    return %c0_i32, %arg0 : i32, i32
  }
}

</mosaic_0001>

<bundles_post_ra>
// kernel: tile.8
= control target key start
LH: loop header
LB: loop body
LE: loop exit
PB: predicated region body
PF: predicated region fallthrough
CT: control target
= control target key end

     0   :  { %s22_s0 = inlined_call_operand.vmem [shape: f32[8], index: 0, kind: input, shape index: {}]   ;;  %s23_s1 = inlined_call_operand.vmem [shape: f32[8,8], index: 1, kind: output, shape index: {}]  }
   0x1   :  { %v4_v0 = vld [vmem:[%s22_s0] ss:$0 sm:$0xff] }
   0x2   :  { %5 = vst [vmem:[%s23_s1] sm:$0xff] %v4_v0 }

// kernel: tile.0
= control target key start
LH: loop header
LB: loop body
LE: loop exit
PB: predicated region body
PF: predicated region fallthrough
CT: control target
= control target key end

     0   :  { %vm3_vm0 = vcmask 7168   ;;  %s84_s8 = smov 125   ;;  %s85_s13 = smov 123   ;;  %s167_s0 = inlined_call_operand.vmem [shape: f32[8,8], index: 0, kind: input, shape index: {}]   ;;  %s168_s1 = inlined_call_operand.vmem [shape: f32[64,1], index: 1, kind: output, shape index: {}]  }
   0x1   :  { %v6_v0 = vld [vmem:[%s167_s0] sm:$0xff]   ;;  %s83_s0 = smov 127   ;;  %s86_s14 = smov 126  }
   0x2   :  { %7 = vrot.lane.b32.xlu0 %v6_v0, %s83_s0  ;;  %23 = vrot.lane.b32.xlu1 %v6_v0, %s84_s8  ;;  %4 = vst.msk [vmem:[%s168_s1] ss:$8 sm:$0xf] %vm3_vm0, %v6_v0   ;;  %s87_s15 = smov 124   ;;  %s88_s16 = smov 122  }
   0x3   :  { %5 = vst.msk [vmem:[%s168_s1] ss:$8 sm:$0xf0] %vm3_vm0, %v6_v0   ;;  %39 = vrot.lane.b32.xlu2 %v6_v0, %s85_s13  ;;  %s89_s17 = smov 121  }
   0xa   :  { %15 = vrot.lane.b32.xlu0 %v6_v0, %s86_s14  ;;  %31 = vrot.lane.b32.xlu1 %v6_v0, %s87_s15 }
   0xb   :  { %47 = vrot.lane.b32.xlu2 %v6_v0, %s88_s16 }
  0x12   :  { %55 = vrot.lane.b32.xlu0 %v6_v0, %s89_s17 }
  0x5d   :  { %v40_v1 = vpop.permute.xlu2 %39  }
  0x5e   :  { %70 = vst.msk [vmem:[%s168_s1 + $0x5] ss:$8 sm:$0xf] %vm3_vm0, %v40_v1  }
  0x5f   :  { %71 = vst.msk [vmem:[%s168_s1 + $0x5] ss:$8 sm:$0xf0] %vm3_vm0, %v40_v1  }
  0x65   :  { %v48_v2 = vpop.permute.xlu2 %47  }
  0x66   :  { %72 = vst.msk [vmem:[%s168_s1 + $0x6] ss:$8 sm:$0xf] %vm3_vm0, %v48_v2  }
  0x67   :  { %73 = vst.msk [vmem:[%s168_s1 + $0x6] ss:$8 sm:$0xf0] %vm3_vm0, %v48_v2  }
  0x74   :  { %v8_v3 = vpop.permute.xlu0 %7   ;;  %v24_v4 = vpop.permute.xlu1 %23  }
  0x75   :  { %62 = vst.msk [vmem:[%s168_s1 + $0x1] ss:$8 sm:$0xf] %vm3_vm0, %v8_v3  }
  0x76   :  { %63 = vst.msk [vmem:[%s168_s1 + $0x1] ss:$8 sm:$0xf0] %vm3_vm0, %v8_v3  }
  0x77   :  { %66 = vst.msk [vmem:[%s168_s1 + $0x3] ss:$8 sm:$0xf] %vm3_vm0, %v24_v4  }
  0x78   :  { %67 = vst.msk [vmem:[%s168_s1 + $0x3] ss:$8 sm:$0xf0] %vm3_vm0, %v24_v4  }
  0x7c   :  { %v16_v5 = vpop.permute.xlu0 %15   ;;  %v32_v6 = vpop.permute.xlu1 %31  }
  0x7d   :  { %64 = vst.msk [vmem:[%s168_s1 + $0x2] ss:$8 sm:$0xf] %vm3_vm0, %v16_v5  }
  0x7e   :  { %65 = vst.msk [vmem:[%s168_s1 + $0x2] ss:$8 sm:$0xf0] %vm3_vm0, %v16_v5  }
  0x7f   :  { %68 = vst.msk [vmem:[%s168_s1 + $0x4] ss:$8 sm:$0xf] %vm3_vm0, %v32_v6  }
  0x80   :  { %69 = vst.msk [vmem:[%s168_s1 + $0x4] ss:$8 sm:$0xf0] %vm3_vm0, %v32_v6  }
  0x84   :  { %v56_v7 = vpop.permute.xlu0 %55  }
  0x85   :  { %74 = vst.msk [vmem:[%s168_s1 + $0x7] ss:$8 sm:$0xf] %vm3_vm0, %v56_v7  }
  0x86   :  { %75 = vst.msk [vmem:[%s168_s1 + $0x7] ss:$8 sm:$0xf0] %vm3_vm0, %v56_v7  }

</bundles_post_ra>
